<compile_context>
chip_gen: v7x
topology: tpu7x:2x2x1
jax: 0.10.0
libtpu: 0.0.40
codegen_flags: <defaults>
</compile_context>

<pallas_src>
import jax
import jax.numpy as jnp
from jax import lax
from jax.experimental import pallas as pl
from jax.experimental.pallas import tpu as pltpu

_MASK_FILL = -1e30  # finite "-inf": avoids NaN rows when a question is fully padded


def align_kernel(ctx_ref, qtn_ref, mask_ref, w_ref, b_ref, out_ref, qtnp_ref):
    # Grid: (batch, lc_tile).  qtn/mask/W/bias blocks are constant along the lc axis,
    # so they stay resident; qtnp_ref (VMEM scratch) carries the projected question
    # across the lc tiles of one batch element.
    lc = pl.program_id(1)

    w = w_ref[...]        # (D, D) bf16, nn.Linear weight (out, in) -- NOT transposed
    bias = b_ref[...]     # (1, D) f32

    # ---- hoisted question projection: once per batch element (lc == 0) -------------
    @pl.when(lc == 0)
    def _():
        qtn = qtn_ref[0]  # (Lq, D) bf16
        # x @ W^T  ==  contract dim 1 of x with dim 1 ("in") of W; no transpose needed.
        qp = lax.dot_general(qtn, w,
                             dimension_numbers=(((1,), (1,)), ((), ())),
                             preferred_element_type=jnp.float32)
        qp = jnp.maximum(qp + bias, 0.0)
        qtnp_ref[...] = qp.astype(jnp.bfloat16)

    # ---- context projection for this Lc tile ---------------------------------------
    ctx = ctx_ref[0]      # (TILE_LC, D) bf16
    cp = lax.dot_general(ctx, w,
                         dimension_numbers=(((1,), (1,)), ((), ())),
                         preferred_element_type=jnp.float32)
    cp = jnp.maximum(cp + bias, 0.0).astype(jnp.bfloat16)

    # ---- align scores: contract feature dim of both projections (no .T) ------------
    scores = lax.dot_general(cp, qtnp_ref[...],
                             dimension_numbers=(((1,), (1,)), ((), ())),
                             preferred_element_type=jnp.float32)      # (TILE_LC, Lq)

    # mask == 1 means padded question position; broadcast over the Lc axis.
    mask = mask_ref[0]    # (1, Lq) f32
    scores = jnp.where(mask > 0.5, _MASK_FILL, scores)

    # ---- softmax over the question axis (f32) --------------------------------------
    m = jnp.max(scores, axis=-1, keepdims=True)
    e = jnp.exp(scores - m)
    denom = jnp.sum(e, axis=-1, keepdims=True)
    alpha = e * pl.reciprocal(denom, approx=True)                     # EUP, not VPU div

    # ---- aligned embedding: alpha @ question ----------------------------------------
    out_ref[0] = jnp.dot(alpha.astype(jnp.bfloat16), qtn_ref[0],
                         preferred_element_type=jnp.float32)          # (TILE_LC, D) f32


def align_question_embedding(context, question, question_mask, weight, bias,
                             *, tile_lc=128):
    """context: (B, Lc, D), question: (B, Lq, D), question_mask: (B, Lq) with 1 == padded.
    weight: (D, D) nn.Linear weight (out, in), bias: (D,).  Returns (B, Lc, D) f32."""
    B, Lc, D = context.shape
    _, Lq, _ = question.shape

    tile_lc = min(tile_lc, Lc)
    grid = (B, pl.cdiv(Lc, tile_lc))

    # bf16 MXU operands (halves HBM/VMEM traffic, 2x MXU throughput); f32 elsewhere.
    ctx_b = context.astype(jnp.bfloat16)
    qtn_b = question.astype(jnp.bfloat16)
    w_b = weight.astype(jnp.bfloat16)
    bias2d = bias.reshape(1, D).astype(jnp.float32)
    mask3d = question_mask.reshape(B, 1, Lq).astype(jnp.float32)

    return pl.pallas_call(
        align_kernel,
        out_shape=jax.ShapeDtypeStruct((B, Lc, D), jnp.float32),
        grid_spec=pltpu.PrefetchScalarGridSpec(
            num_scalar_prefetch=0,
            grid=grid,
            in_specs=[
                pl.BlockSpec((1, tile_lc, D), lambda b, i: (b, i, 0)),  # context tile
                pl.BlockSpec((1, Lq, D), lambda b, i: (b, 0, 0)),       # question (per batch)
                pl.BlockSpec((1, 1, Lq), lambda b, i: (b, 0, 0)),       # mask (per batch)
                pl.BlockSpec((D, D), lambda b, i: (0, 0)),              # W (shared)
                pl.BlockSpec((1, D), lambda b, i: (0, 0)),              # bias (shared)
            ],
            out_specs=pl.BlockSpec((1, tile_lc, D), lambda b, i: (b, i, 0)),
            scratch_shapes=[pltpu.VMEM((Lq, D), jnp.bfloat16)],         # relu(qtn @ W^T + b)
        ),
        compiler_params=pltpu.CompilerParams(
            dimension_semantics=("parallel", "arbitrary")),
    )(ctx_b, qtn_b, mask3d, w_b, bias2d)


def _reference(context, question, question_mask, weight, bias):
    """Pure-XLA reference mirroring the kernel's precision choices (bf16 MXU inputs,
    f32 accumulation / softmax, finite mask fill)."""
    cb = context.astype(jnp.bfloat16)
    qb = question.astype(jnp.bfloat16)
    wb = weight.astype(jnp.bfloat16)
    ctx_p = jnp.maximum(
        jnp.einsum("bld,od->blo", cb, wb, preferred_element_type=jnp.float32) + bias, 0.0
    ).astype(jnp.bfloat16)
    qtn_p = jnp.maximum(
        jnp.einsum("bld,od->blo", qb, wb, preferred_element_type=jnp.float32) + bias, 0.0
    ).astype(jnp.bfloat16)
    scores = jnp.einsum("bcd,bqd->bcq", ctx_p, qtn_p, preferred_element_type=jnp.float32)
    mask = question_mask[:, None, :]
    scores = jnp.where(mask > 0.5, _MASK_FILL, scores)
    alpha = jax.nn.softmax(scores, axis=-1).astype(jnp.bfloat16)
    return jnp.einsum("bcq,bqd->bcd", alpha, qb, preferred_element_type=jnp.float32)


if __name__ == "__main__":
    # Small but hardware-friendly shapes: D = 128 (lane-dense), Lc = 2 tiles of 128.
    B, Lc, Lq, D = 2, 256, 64, 128

    key = jax.random.PRNGKey(0)
    k_ctx, k_qtn, k_w, k_b = jax.random.split(key, 4)

    context = jax.random.normal(k_ctx, (B, Lc, D), dtype=jnp.float32)
    question = jax.random.normal(k_qtn, (B, Lq, D), dtype=jnp.float32)

    # Deterministic padding mask: 1 == padded question position (each row has valid tokens).
    valid_lens = jnp.array([40, 17], dtype=jnp.int32)
    pos = jnp.arange(Lq)[None, :]
    question_mask = (pos >= valid_lens[:, None]).astype(jnp.float32)   # (B, Lq)

    # Deterministic nn.Linear(D, D) parameters.
    weight = jax.random.normal(k_w, (D, D), dtype=jnp.float32) * (1.0 / jnp.sqrt(D))
    bias = jax.random.normal(k_b, (D,), dtype=jnp.float32) * 0.1

    out = align_question_embedding(context, question, question_mask, weight, bias)
    out = jax.block_until_ready(out)

    ref = _reference(context, question, question_mask, weight, bias)
    assert out.shape == (B, Lc, D)
    max_err = float(jnp.max(jnp.abs(out - ref)))
    assert jnp.allclose(out, ref, atol=2e-2, rtol=2e-2), f"mismatch vs reference, max_err={max_err}"

    print("KERNEL_OK")
</pallas_src>

<mosaic_0001>
module attributes {stable_mosaic.version = 11 : i64} {
  func.func @align_kernel(%arg0: i32, %arg1: i32, %arg2: memref<1x128x128xbf16, #tpu.memory_space<vmem>>, %arg3: memref<1x64x128xbf16, #tpu.memory_space<vmem>>, %arg4: memref<1x1x64xf32, #tpu.memory_space<vmem>>, %arg5: memref<128x128xbf16, #tpu.memory_space<vmem>>, %arg6: memref<1x128xf32, #tpu.memory_space<vmem>>, %arg7: memref<1x128x128xf32, #tpu.memory_space<vmem>>, %arg8: memref<64x128xbf16, #tpu.memory_space<vmem>>) attributes {dimension_semantics = [#tpu.dimension_semantics<parallel>, #tpu.dimension_semantics<arbitrary>], iteration_bounds = array<i64: 2, 2>, scalar_prefetch = 0 : i64, scratch_operands = 1 : i64, tpu.core_type = #tpu.core_type<tc>, window_params = [{transform_indices = @transform_0, window_bounds = array<i64: 1, 128, 128>}, {transform_indices = @transform_1, window_bounds = array<i64: 1, 64, 128>}, {transform_indices = @transform_2, window_bounds = array<i64: 1, 1, 64>}, {pipeline_mode = #tpu.pipeline_mode<synchronous>, transform_indices = @transform_3, window_bounds = array<i64: 128, 128>}, {pipeline_mode = #tpu.pipeline_mode<synchronous>, transform_indices = @transform_4, window_bounds = array<i64: 1, 128>}, {transform_indices = @transform_5, window_bounds = array<i64: 1, 128, 128>}]} {
    %c0 = arith.constant 0 : index
    %c0_0 = arith.constant 0 : index
    %0 = vector.load %arg5[%c0, %c0_0] : memref<128x128xbf16, #tpu.memory_space<vmem>>, vector<128x128xbf16>
    %c0_1 = arith.constant 0 : index
    %c0_2 = arith.constant 0 : index
    %1 = vector.load %arg6[%c0_1, %c0_2] : memref<1x128xf32, #tpu.memory_space<vmem>>, vector<1x128xf32>
    %c0_i32 = arith.constant 0 : i32
    %2 = arith.cmpi eq, %arg1, %c0_i32 : i32
    %3 = arith.extui %2 : i1 to i32
    %c0_i32_3 = arith.constant 0 : i32
    %4 = arith.cmpi ne, %3, %c0_i32_3 : i32
    scf.if %4 {
      %c0_25 = arith.constant 0 : index
      %c0_26 = arith.constant 0 : index
      %c0_27 = arith.constant 0 : index
      %40 = vector.load %arg3[%c0_25, %c0_26, %c0_27] : memref<1x64x128xbf16, #tpu.memory_space<vmem>>, vector<1x64x128xbf16>
      %41 = vector.shape_cast %40 : vector<1x64x128xbf16> to vector<64x128xbf16>
      %cst_28 = arith.constant dense<0.000000e+00> : vector<64x128xf32>
      %42 = tpu.matmul %41, %0, %cst_28 {dimension_numbers = #tpu.dot_dimension_numbers<[1], [1], [0], [0], [0, 0, 1, 0], [], []>} : vector<64x128xbf16>, vector<128x128xbf16>, vector<64x128xf32> -> vector<64x128xf32>
      %43 = vector.broadcast %1 : vector<1x128xf32> to vector<64x128xf32>
      %44 = arith.addf %42, %43 : vector<64x128xf32>
      %cst_29 = arith.constant 0.000000e+00 : f32
      %45 = vector.broadcast %cst_29 : f32 to vector<64x128xf32>
      %46 = arith.maximumf %44, %45 : vector<64x128xf32>
      %47 = arith.truncf %46 : vector<64x128xf32> to vector<64x128xbf16>
      %c0_30 = arith.constant 0 : index
      %c0_31 = arith.constant 0 : index
      %48 = vector.load %arg8[%c0_30, %c0_31] : memref<64x128xbf16, #tpu.memory_space<vmem>>, vector<64x128xbf16>
      tpu.vector_store %arg8[%c0_30, %c0_31], %47 {strides = array<i32>} : memref<64x128xbf16, #tpu.memory_space<vmem>>, vector<64x128xbf16>,
    } else {
    }
    %c0_4 = arith.constant 0 : index
    %c0_5 = arith.constant 0 : index
    %c0_6 = arith.constant 0 : index
    %5 = vector.load %arg2[%c0_4, %c0_5, %c0_6] : memref<1x128x128xbf16, #tpu.memory_space<vmem>>, vector<1x128x128xbf16>
    %6 = vector.shape_cast %5 : vector<1x128x128xbf16> to vector<128x128xbf16>
    %cst = arith.constant dense<0.000000e+00> : vector<128x128xf32>
    %7 = tpu.matmul %6, %0, %cst {dimension_numbers = #tpu.dot_dimension_numbers<[1], [1], [0], [0], [0, 0, 1, 0], [], []>} : vector<128x128xbf16>, vector<128x128xbf16>, vector<128x128xf32> -> vector<128x128xf32>
    %8 = vector.broadcast %1 : vector<1x128xf32> to vector<128x128xf32>
    %9 = arith.addf %7, %8 : vector<128x128xf32>
    %cst_7 = arith.constant 0.000000e+00 : f32
    %10 = vector.broadcast %cst_7 : f32 to vector<128x128xf32>
    %11 = arith.maximumf %9, %10 : vector<128x128xf32>
    %12 = arith.truncf %11 : vector<128x128xf32> to vector<128x128xbf16>
    %c0_8 = arith.constant 0 : index
    %c0_9 = arith.constant 0 : index
    %13 = vector.load %arg8[%c0_8, %c0_9] : memref<64x128xbf16, #tpu.memory_space<vmem>>, vector<64x128xbf16>
    %cst_10 = arith.constant dense<0.000000e+00> : vector<128x64xf32>
    %14 = tpu.matmul %12, %13, %cst_10 {dimension_numbers = #tpu.dot_dimension_numbers<[1], [1], [0], [0], [0, 0, 1, 0], [], []>} : vector<128x128xbf16>, vector<64x128xbf16>, vector<128x64xf32> -> vector<128x64xf32>
    %c0_11 = arith.constant 0 : index
    %c0_12 = arith.constant 0 : index
    %c0_13 = arith.constant 0 : index
    %15 = vector.load %arg4[%c0_11, %c0_12, %c0_13] : memref<1x1x64xf32, #tpu.memory_space<vmem>>, vector<1x1x64xf32>
    %16 = vector.shape_cast %15 : vector<1x1x64xf32> to vector<1x64xf32>
    %cst_14 = arith.constant 5.000000e-01 : f32
    %17 = vector.broadcast %cst_14 : f32 to vector<1x64xf32>
    %18 = arith.cmpf ogt, %16, %17 : vector<1x64xf32>
    %cst_15 = arith.constant -1.000000e+30 : f32
    %19 = vector.shape_cast %18 : vector<1x64xi1> to vector<1x64xi1>
    %20 = vector.broadcast %19 : vector<1x64xi1> to vector<128x64xi1>
    %21 = vector.broadcast %cst_15 : f32 to vector<128x64xf32>
    %22 = arith.select %20, %21, %14 : vector<128x64xi1>, vector<128x64xf32>
    %cst_16 = arith.constant dense<0xFF800000> : vector<128xf32>
    %23 = vector.multi_reduction <maximumf>, %22, %cst_16 [1] : vector<128x64xf32> to vector<128xf32>
    %24 = vector.shape_cast %23 : vector<128xf32> to vector<128x1xf32>
    %25 = vector.broadcast %24 : vector<128x1xf32> to vector<128x64xf32>
    %26 = arith.subf %22, %25 : vector<128x64xf32>
    %27 = math.exp %26 : vector<128x64xf32>
    %cst_17 = arith.constant dense<0.000000e+00> : vector<128xf32>
    %28 = vector.multi_reduction <add>, %27, %cst_17 [1] : vector<128x64xf32> to vector<128xf32>
    %29 = vector.shape_cast %28 : vector<128xf32> to vector<128x1xf32>
    %30 = tpu.reciprocal %29 {approx = true} : vector<128x1xf32> -> vector<128x1xf32>
    %31 = vector.broadcast %30 : vector<128x1xf32> to vector<128x64xf32>
    %32 = arith.mulf %27, %31 : vector<128x64xf32>
    %33 = arith.truncf %32 : vector<128x64xf32> to vector<128x64xbf16>
    %c0_18 = arith.constant 0 : index
    %c0_19 = arith.constant 0 : index
    %c0_20 = arith.constant 0 : index
    %34 = vector.load %arg3[%c0_18, %c0_19, %c0_20] : memref<1x64x128xbf16, #tpu.memory_space<vmem>>, vector<1x64x128xbf16>
    %35 = vector.shape_cast %34 : vector<1x64x128xbf16> to vector<64x128xbf16>
    %cst_21 = arith.constant dense<0.000000e+00> : vector<128x128xf32>
    %36 = tpu.matmul %33, %35, %cst_21 {dimension_numbers = #tpu.dot_dimension_numbers<[1], [0], [0], [1], [0, 0, 1, 1], [], []>} : vector<128x64xbf16>, vector<64x128xbf16>, vector<128x128xf32> -> vector<128x128xf32>
    %c0_22 = arith.constant 0 : index
    %c0_23 = arith.constant 0 : index
    %c0_24 = arith.constant 0 : index
    %37 = vector.load %arg7[%c0_22, %c0_23, %c0_24] : memref<1x128x128xf32, #tpu.memory_space<vmem>>, vector<1x128x128xf32>
    %38 = vector.shape_cast %37 : vector<1x128x128xf32> to vector<128x128xf32>
    %39 = vector.shape_cast %36 : vector<128x128xf32> to vector<1x128x128xf32>
    tpu.vector_store %arg7[%c0_22, %c0_23, %c0_24], %39 {strides = array<i32>} : memref<1x128x128xf32, #tpu.memory_space<vmem>>, vector<1x128x128xf32>,
    return
  }
  func.func @transform_0(%arg0: i32, %arg1: i32) -> (i32, i32, i32) {
    %c0_i32 = arith.constant 0 : i32
    %c0_i32_0 = arith.constant 0 : i32
    return %arg0, %arg1, %c0_i32 : i32, i32, i32
  }
  func.func @transform_1(%arg0: i32, %arg1: i32) -> (i32, i32, i32) {
    %c0_i32 = arith.constant 0 : i32
    %c0_i32_0 = arith.constant 0 : i32
    %c0_i32_1 = arith.constant 0 : i32
    return %arg0, %c0_i32, %c0_i32_0 : i32, i32, i32
  }
  func.func @transform_2(%arg0: i32, %arg1: i32) -> (i32, i32, i32) {
    %c0_i32 = arith.constant 0 : i32
    %c0_i32_0 = arith.constant 0 : i32
    %c0_i32_1 = arith.constant 0 : i32
    return %arg0, %c0_i32, %c0_i32_0 : i32, i32, i32
  }
  func.func @transform_3(%arg0: i32, %arg1: i32) -> (i32, i32) {
    %c0_i32 = arith.constant 0 : i32
    %c0_i32_0 = arith.constant 0 : i32
    %c0_i32_1 = arith.constant 0 : i32
    return %c0_i32, %c0_i32_0 : i32, i32
  }
  func.func @transform_4(%arg0: i32, %arg1: i32) -> (i32, i32) {
    %c0_i32 = arith.constant 0 : i32
    %c0_i32_0 = arith.constant 0 : i32
    %c0_i32_1 = arith.constant 0 : i32
    return %c0_i32, %c0_i32_0 : i32, i32
  }
  func.func @transform_5(%arg0: i32, %arg1: i32) -> (i32, i32, i32) {
    %c0_i32 = arith.constant 0 : i32
    %c0_i32_0 = arith.constant 0 : i32
    return %arg0, %arg1, %c0_i32 : i32, i32, i32
  }
}

</mosaic_0001>

<bundles_post_ra>
// kernel: tpu_custom_call.1
= control target key start
LH: loop header
LB: loop body
LE: loop exit
PB: predicated region body
PF: predicated region fallthrough
CT: control target
= control target key end

     0   :  { %s2745_s0 = inlined_call_operand.hbm [shape: bf16[2,256,128], index: 0, kind: input, shape index: {}]   ;;  %s2746_s1 = inlined_call_operand.hbm [shape: bf16[2,64,128], index: 1, kind: input, shape index: {}]   ;;  %s2747_s2 = inlined_call_operand.vmem [shape: f32[2,1,64], index: 2, kind: input, shape index: {}]   ;;  %s2748_s3 = inlined_call_operand.hbm [shape: bf16[128,128], index: 3, kind: input, shape index: {}]   ;;  %s2749_s4 = inlined_call_operand.vmem [shape: f32[1,128], index: 4, kind: input, shape index: {}]   ;;  %s2750_s5 = inlined_call_operand.hbm [shape: f32[2,256,128], index: 5, kind: output, shape index: {}]  }
   0x1   :  { %2768 = sst [smem:[#allocation20_spill]] %s2747_s2 }
   0x2   :  { %2769 = sst [smem:[#allocation21_spill]] %s2748_s3 }
   0x3   :  { %2770 = sst [smem:[#allocation22_spill]] %s2749_s4 }
   0x4   :  { %2771 = sst [smem:[#allocation23_spill]] %s2750_s5 }
   0x5   :  { %10 = vsyncpa [#allocation4], 0 }
   0x6   :  { %12 = vsyncpa [#allocation4 + $0x1], 0 }
   0x7   :  { %13 = vsyncpa [#allocation7], 0 }
   0x8   :  { %15 = vsyncpa [#allocation7 + $0x1], 0 }
   0x9   :  { %16 = vsyncpa [#allocation5], 0 }
   0xa   :  { %18 = vsyncpa [#allocation5 + $0x1], 0  ;;  %s2084_s18 = smov 0   ;;  %s2086_s19 = smov 0  }
   0xb   :  { %s2088_s20 = smov 0   ;;  %s2090_s21 = smov 0  }
   0xc   :  { %s2092_s22 = smov 0   ;;  %s2094_s23 = smov 0  }
   0xd   :  { %s2096_s24 = smov 0   ;;  %s2098_s25 = smov 0  }
   0xe   :  { %s2100_s26 = smov 0   ;;  %s2102_s27 = smov 0  }
   0xf   :  { %s2104_s28 = smov 0  }
  0x10 LB: > { %2772 = sst [smem:[#allocation14_spill]] %s2015_s21  ;;  %s2138_s29 = sadd.s32 4294967295, %s2043_s28   ;;  %s2043_s28 = sphi %s2104_s28, %s24_s28   ;;  %s2039_s27 = sphi %s2102_s27, %s2820_s27   ;;  %s2035_s26 = sphi %s2100_s26, %s2819_s26   ;;  %s2031_s25 = sphi %s2098_s25, %s2818_s25   ;;  %s2027_s24 = sphi %s2096_s24, %s2817_s24   ;;  %s2023_s23 = sphi %s2094_s23, %s2816_s23   ;;  %s2019_s22 = sphi %s2092_s22, %s2815_s22   ;;  %s2015_s21 = sphi %s2090_s21, %s2814_s21   ;;  %s2011_s20 = sphi %s2088_s20, %s2813_s20   ;;  %s2007_s19 = sphi %s2086_s19, %s2812_s19   ;;  %s2003_s18 = sphi %s2084_s18, %s2811_s18  }
  0x11   : > { %2773 = sst [smem:[#allocation15_spill]] %s2027_s24  ;;  %s1386_s30 = sadd.s32 4294967294, %s2043_s28  }
  0x12   : > { %p58_p0 = scmp.ne.s32.totalorder %s2019_s22, %s2015_s21  ;;  %p2751_p1 = scmp.eq.s32.totalorder %s2138_s29, 0 }
  0x13   : > { %p84_p2 = scmp.ne.s32.totalorder %s2007_s19, %s2003_s18  ;;  %p184_p5 = scmp.eq.s32.totalorder %s1386_s30, 3 }
  0x14   : > { %p2148_p4 = por %p2751_p1, %p58_p0  ;;  %p1387_p7 = scmp.ge.s32.totalorder %s2043_s28, 1 }
  0x15   : > { %p2154_p6 = por %p84_p2, %p2751_p1  ;;  %p2159_p8 = por %p184_p5, %p58_p0 }
  0x16   : > { %s2774_s6 = scalar_select %p2148_p4, 1, 0 }
  0x17   : > { %s2775_s7 = scalar_select %p2154_p6, 1, 0 }
  0x18   : > { %s2776_s8 = scalar_select %p2159_p8, 1, 0 }
  0x19   : > { %p191_p9 = scmp.lt.s32.totalorder %s2043_s28, 5  ;;  %s2045_s10 = smov [#allocation8]  }
  0x1a   : > { %2777 = sst [smem:[#allocation16_spill]] %s2776_s8  ;;  %s203_s11 = sshll.u32 %s2045_s10, 4  ;;  %s204_s11 = int_to_ptr.vmem [resolvable:$true] %s203_s11 }
  0x1b   : > { %p2164_p10 = pnand %p1387_p7, %p191_p9  ;;  %s2780_s3 = sld [smem:[#allocation21_spill]] }
  0x1d   : > { %s2778_s9 = scalar_select %p2164_p10, 1, 0 }
  0x1e   : > { %p1632_p11 = pneg %p2164_p10 }
  0x20   : > { %p2172_p12 = pnand %p1632_p11, %p2751_p1 }
  0x21   : > { %s1825_s15 = scalar_lea.hbm %s2780_s3, 1024 }
  0x22   : > { %p1826_p13 = scmp.ne.s32.totalorder %s2780_s3, %s1825_s15  ;;  %p1827_p0 = pneg %p2172_p12 }
  0x23   : > { %p1832_p7 = scmp.lt.u32.totalorder %s1825_s15, %s2780_s3 }
  0x24   : > { %p1828_p2 = pnand %p1827_p0, %p1826_p13 }
  0x26   : > { %p1829_p5 = pneg %p1828_p2 }
  0x28   : > { %p1834_p9 = pnand %p1832_p7, %p1829_p5 }
  0x2a   : > { %1837 = shalt.err (!%p1834_p9)
}
  0x2b   : > { %s1838_s10 = scalar_lea.vmem %s204_s11, 1024  ;;  %p1846_p8 = scmp.lt.s32.totalorder %s204_s11, %s204_s11 }
  0x2c   : > { %p1839_p11 = scmp.ne.s32.totalorder %s204_s11, %s1838_s10  ;;  %p1847_p6 = scmp.lt.s32.totalorder %s1838_s10, %s1838_s10 }
  0x2e   : > { %p1841_p1 = pnand %p1839_p11, %p1827_p0  ;;  %p1848_p4 = por %p1847_p6, %p1846_p8 }
  0x30   : > { %p1842_p3 = pneg %p1841_p1 }
  0x32   : > { %p1849_p10 = pnand %p1848_p4, %p1842_p3 }
  0x34   : > { %1852 = shalt.err (!%p1849_p10)
}
  0x35   : > { %s2755_s13 = smov 64   ;;  %s2757_s14 = smov 4  }
  0x36   : > { %1635 = dma.hbm_to_vmem [thread:$0]  (!%p2172_p12), %s2780_s3, 1024, %s204_s11, [#allocation7], %s2755_s13, %s2755_s13, %s2757_s14  }
  0x37   : > { %s33_s17 = sadd.s32 1, %s2035_s26  ;;  %s36_s18 = sadd.s32 1, %s2039_s27 }
  0x38   : > { %p34_p1 = scmp.ge.s32.totalorder %s33_s17, 2  ;;  %s45_s30 = sadd.s32 1, %s2023_s23 }
  0x39   : > { %p52_p3 = scmp.ne.s32.totalorder %s2023_s23, %s2019_s22  ;;  %p2767_p4 = scmp.eq.s32.totalorder %s2043_s28, 0 }
  0x3a   : > { %s2822_s17 = smov (%p34_p1, %s33_s17), 0  ;;  %s2824_s18 = smov (!%p34_p1, %s36_s18), %s2039_s27 }
  0x3b   : > { %2781 = sst [smem:[#allocation17_spill]] %s2822_s17  ;;  %s41_s12 = ssub.s32 %s2035_s26, %s2822_s17 }
  0x3c   : > { %p38_p6 = scmp.ge.s32.totalorder %s2824_s18, 2  ;;  %p2782_p8 = scmp.eq.s32.totalorder %s2138_s29, 3 }
  0x3d   : > { %p2214_p12 = por %p2767_p4, %p52_p3  ;;  %p2766_p13 = scmp.lt.s32.totalorder %s2043_s28, 4 }
  0x3e   : > { %p2208_p10 = por %p2782_p8, %p52_p3  ;;  %s2826_s18 = smov (%p38_p6, %s2824_s18), 0 }
  0x3f   : > { %2786 = sst [smem:[#allocation19_spill]] %s2826_s18  ;;  %s220_s15 = sand.u32 1, %s2023_s23  }
  0x40   : > { %s2783_s10 = scalar_select %p2208_p10, 1, 0 }
  0x41   : > { %s1391_s16 = sshll.u32 %s2035_s26, 4  ;;  %s2225_s13 = ssub.s32 %s2039_s27, %s2826_s18 }
  0x42   : > { %2784 = sst [smem:[#allocation18_spill]] %s2783_s10  ;;  %s42_s14 = sor.u32 %s41_s12, %s2225_s13 }
  0x43   : > { %p43_p2 = scmp.eq.s32.totalorder %s42_s14, 0  ;;  %s1390_s3 = sshll.u32 %s220_s15, 6 }
  0x44   : > { %s1392_s17 = sshll.u32 %s2039_s27, 5  ;;  %s224_s5 = scalar_lea.vmem [#allocation3], %s1390_s3 }
  0x45   : > { %s2231_s8 = scalar_select %p43_p2, %s2023_s23, %s45_s30  }
  0x46   : > { %s230_s21 = sadd.s32 %s1392_s17, %s1391_s16  ;;  %s233_s10 = sshll.u32 %s224_s5, 4  ;;  %s2233_s10 = int_to_ptr.vmem [resolvable:$true] %s233_s10 }
  0x47   : > { %s1393_s24 = sshll.u32 %s230_s21, 6  ;;  %p2244_p5 = pnand %p2766_p13, %p2214_p12 }
  0x48   : > { %s2238_s18 = scalar_lea.hbm %s2745_s0, %s1393_s24  ;;  %s243_s3 = sand.u32 1, %s2043_s28  }
  0x49   : > { %s2249_s5 = scalar_lea.sflag [#allocation4], %s220_s15  ;;  %s1853_s21 = scalar_lea.hbm %s2238_s18, 1024 }
  0x4a   : > { %p1854_p7 = scmp.ne.s32.totalorder %s2238_s18, %s1853_s21  ;;  %p1855_p9 = pneg %p2244_p5 }
  0x4b   : > { %s1858_s24 = scalar_lea.hbm %s2745_s0, 4096  ;;  %p1859_p3 = scmp.lt.u32.totalorder %s2238_s18, %s2745_s0 }
  0x4c   : > { %p1856_p11 = pnand %p1855_p9, %p1854_p7  ;;  %p1860_p6 = scmp.lt.u32.totalorder %s1858_s24, %s1853_s21 }
  0x4d   : > { %p1862_p12 = scmp.lt.u32.totalorder %s1853_s21, %s2238_s18 }
  0x4e   : > { %p1857_p1 = pneg %p1856_p11  ;;  %p1861_p8 = por %p1860_p6, %p1859_p3 }
  0x50   : > { %p1863_p2 = por %p1862_p12, %p1861_p8 }
  0x52   : > { %p1864_p13 = pnand %p1863_p2, %p1857_p1 }
  0x54   : > { %1867 = shalt.err (!%p1864_p13)
}
  0x55   : > { %s1868_s12 = scalar_lea.vmem %s2233_s10, 1024  ;;  %s2048_s11 = smov [#allocation3]  }
  0x56   : > { %p1869_p7 = scmp.ne.s32.totalorder %s2233_s10, %s1868_s12  ;;  %s1873_s15 = sshll.u32 %s2048_s11, 4  ;;  %s1874_s15 = int_to_ptr.vmem [resolvable:$false] %s1873_s15 }
  0x57   : > { %s1875_s16 = scalar_lea.vmem %s1874_s15, 2048  ;;  %p1876_p0 = scmp.lt.s32.totalorder %s2233_s10, %s1874_s15 }
  0x58   : > { %p1871_p11 = pnand %p1869_p7, %p1855_p9  ;;  %p1877_p3 = scmp.lt.s32.totalorder %s1875_s16, %s1868_s12 }
  0x5a   : > { %p1872_p4 = pneg %p1871_p11  ;;  %p1878_p6 = por %p1877_p3, %p1876_p0 }
  0x5c   : > { %p1879_p8 = pnand %p1878_p6, %p1872_p4 }
  0x5e   : > { %1882 = shalt.err (!%p1879_p8)
}
  0x5f   : > { %s2788_s21 = smov 4   ;;  %s2789_s2 = smov 64  }
  0x60   : > { %1639 = dma.hbm_to_vmem [thread:$0]  (!%p2244_p5), %s2238_s18, 1024, %s2233_s10, %s2249_s5, %s2789_s2, %s2789_s2, %s2788_s21  }
  0x61   : > { %s71_s4 = sadd.s32 1, %s2011_s20  ;;  %p78_p4 = scmp.ne.s32.totalorder %s2011_s20, %s2007_s19 }
  0x62   : > { %p2790_p13 = scmp.eq.s32.totalorder %s2225_s13, 0  ;;  %p2791_p0 = scmp.eq.s32.totalorder %s2043_s28, 0 }
  0x63   : > { %s245_s24 = sand.u32 1, %s2011_s20   ;;  %s1449_s17 = sshll.u32 %s2039_s27, 9 }
  0x64   : > { %s2286_s14 = scalar_select %p2790_p13, %s2011_s20, %s71_s4  }
  0x65   : > { %p80_p9 = por %p78_p4, %p2791_p0  ;;  %s1394_s30 = sshll.u32 %s245_s24, 5 }
  0x66   : > { %s2295_s15 = scalar_lea.hbm %s2746_s1, %s1449_s17  ;;  %p2792_p1 = scmp.lt.s32.totalorder %s2043_s28, 4 }
  0x67   : > { %s247_s13 = scalar_lea.vmem [#allocation6], %s1394_s30  ;;  %s2307_s5 = scalar_lea.sflag [#allocation7], %s243_s3 }
  0x68   : > { %p2299_p5 = pnand %p2792_p1, %p80_p9  ;;  %s254_s10 = sshll.u32 %s247_s13, 4  ;;  %s2303_s10 = int_to_ptr.vmem [resolvable:$true] %s254_s10 }
  0x69   : > { %s1883_s16 = scalar_lea.hbm %s2295_s15, 512  ;;  %s1888_s17 = scalar_lea.hbm %s2746_s1, 1024 }
  0x6a   : > { %p1884_p12 = scmp.ne.s32.totalorder %s2295_s15, %s1883_s16  ;;  %p1885_p2 = pneg %p2299_p5 }
  0x6b   : > { %p1889_p3 = scmp.lt.u32.totalorder %s2295_s15, %s2746_s1  ;;  %p1890_p6 = scmp.lt.u32.totalorder %s1888_s17, %s1883_s16 }
  0x6c   : > { %p1886_p7 = pnand %p1885_p2, %p1884_p12  ;;  %p1892_p4 = scmp.lt.u32.totalorder %s1883_s16, %s2295_s15 }
  0x6d   : > { %p1891_p8 = por %p1890_p6, %p1889_p3 }
  0x6e   : > { %p1887_p11 = pneg %p1886_p7 }
  0x6f   : > { %p1893_p13 = por %p1892_p4, %p1891_p8 }
  0x71   : > { %p1894_p0 = pnand %p1893_p13, %p1887_p11 }
  0x73   : > { %1897 = shalt.err (!%p1894_p0)
}
  0x74   : > { %s1898_s3 = scalar_lea.vmem %s2303_s10, 512  ;;  %s2049_s11 = smov [#allocation6]  }
  0x75   : > { %p1899_p9 = scmp.ne.s32.totalorder %s2303_s10, %s1898_s3  ;;  %s1903_s13 = sshll.u32 %s2049_s11, 4  ;;  %s1904_s13 = int_to_ptr.vmem [resolvable:$false] %s1903_s13 }
  0x76   : > { %s1905_s4 = scalar_lea.vmem %s1904_s13, 1024  ;;  %p1906_p7 = scmp.lt.s32.totalorder %s2303_s10, %s1904_s13 }
  0x77   : > { %p1901_p1 = pnand %p1899_p9, %p1885_p2  ;;  %p1907_p3 = scmp.lt.s32.totalorder %s1905_s4, %s1898_s3 }
  0x79   : > { %p1902_p12 = pneg %p1901_p1  ;;  %p1908_p6 = por %p1907_p3, %p1906_p7 }
  0x7b   : > { %p1909_p8 = pnand %p1908_p6, %p1902_p12 }
  0x7d   : > { %1912 = shalt.err (!%p1909_p8)
}
  0x7e   : > { %1642 = dma.hbm_to_vmem [thread:$0]  (!%p2299_p5), %s2295_s15, 512, %s2303_s10, %s2307_s5, %s2789_s2, %s2789_s2, %s2788_s21  }
  0x7f   : > { %p2794_p2 = scmp.ne.s32.totalorder %s2778_s9, 0 }
  0x80   : > { %s2341_s16 = sand.u32 (!%p2794_p2), 1, %s2019_s22   ;;  %p2795_p11 = scmp.ne.s32.totalorder (!%p2794_p2), %s2774_s6, 0 }
  0x81   : > { %272 = sbr.rel (%p2794_p2) target bundleno = 1526 (0x5f6), region = 40  ;;  %s1398_s24 = sshll.u32 (!%p2794_p2), %s2341_s16, 6 }
  0x82   : > { %s275_s17 = scalar_lea.sflag (!%p2794_p2), [#allocation4], %s2341_s16  ;;  %s2345_s12 = scalar_lea.vmem (!%p2794_p2), [#allocation3], %s1398_s24 }
  0x88   : > { %1986 = dma.done.wait (%p2795_p11), %s275_s17, 1024  }
  0x89   : > { %1988 = vsyncadd (%p2795_p11), %s275_s17, 4294966272  ;;  %s283_s9 = sand.u32 1, %s2138_s29   ;;  %s285_s21 = sand.u32 1, %s2007_s19  }
  0x8a   : > { %s1399_s2 = sshll.u32 %s285_s21, 5  ;;  %s284_s15 = scalar_lea.sflag [#allocation7], %s283_s9 }
  0x8b   : > { %s2353_s18 = scalar_lea.vmem [#allocation6], %s1399_s2  ;;  %p2796_p5 = scmp.ne.s32.totalorder %s2775_s7, 0 }
  0x8d   : > { %1990 = dma.done.wait (%p2796_p5), %s284_s15, 512  }
  0x8e   : > { %1992 = vsyncadd (%p2796_p5), %s284_s15, 4294966784  ;;  %p2797_p4 = scmp.eq.s32.totalorder %s2138_s29, 0 }
  0x90   : > { %1994 = dma.done.wait (%p2797_p4), [#allocation7], 1024   ;;  %p2798_p13 = pmov %p2797_p4 }
  0x91   : > { %s1401_s6 = sshll.u32 %s2341_s16, 7  ;;  %p327_p0 = scmp.lt.s32.totalorder %s2031_s25, 1  ;;  %v2372_v0 = vld [vmem:[#allocation8] sm:$0xf]  ;;  %v2374_v1 = vld [vmem:[#allocation8 + $0x4] sm:$0xf] }
  0x92   : > { %1996 = vsyncadd (%p2798_p13), [#allocation7], 4294966272  ;;  %s2799_s3 = sld [smem:[#allocation20_spill]]  ;;  %v2376_v2 = vld [vmem:[#allocation8 + $0x8] sm:$0xf]  ;;  %s2800_s13 = sld [smem:[#allocation22_spill]] }
  0x93   : > { %s2366_s10 = scalar_select %p327_p0, %s2031_s25, 1  ;;  %v2378_v3 = vld [vmem:[#allocation8 + $0xc] sm:$0xf]  ;;  %v2380_v4 = vld [vmem:[#allocation8 + $0x10] sm:$0xf] }
  0x94   : > { %v2382_v5 = vld [vmem:[#allocation8 + $0x14] sm:$0xf]  ;;  %v2384_v6 = vld [vmem:[#allocation8 + $0x18] sm:$0xf]  ;;  %v2386_v7 = vld [vmem:[#allocation8 + $0x1c] sm:$0xf] }
  0x95   : > { %v2388_v8 = vld [vmem:[#allocation8 + $0x20] sm:$0xf]  ;;  %v2390_v9 = vld [vmem:[#allocation8 + $0x24] sm:$0xf]  ;;  %v2392_v10 = vld [vmem:[#allocation8 + $0x28] sm:$0xf] }
  0x96   : > { %v2394_v11 = vld [vmem:[#allocation8 + $0x2c] sm:$0xf]  ;;  %v2396_v12 = vld [vmem:[#allocation8 + $0x30] sm:$0xf]  ;;  %v2398_v13 = vld [vmem:[#allocation8 + $0x34] sm:$0xf] }
  0x97   : > { %v2400_v14 = vld [vmem:[#allocation8 + $0x38] sm:$0xf]  ;;  %v2402_v15 = vld [vmem:[#allocation8 + $0x3c] sm:$0xf]  ;;  %s2409_s4 = scalar_lea.vmem [#allocation9], %s1401_s6  ;;  %s2801_s24 = sld [smem:[#allocation15_spill]] }
  0x98   : > { %s329_s11 = scalar_lea.vmem %s2799_s3, %s2366_s10  ;;  %v2407_v16 = vld [vmem:[%s2800_s13] sm:$0x1] }
  0x9d   : > { %p1402_p9 = scmp.ne.s32.totalorder %s2801_s24, 0 }
  0x9e   : > { %v1407_v17 = vcombine.low (!%p1402_p9), %v2372_v0, %v2374_v1  ;;  %v1408_v18 = vcombine.low (!%p1402_p9), %v2376_v2, %v2378_v3  ;;  %v1745_v19 = vld [vmem:[%s2353_s18] sm:$0xff] (!%p1402_p9)   ;;  %v1746_v20 = vld [vmem:[%s2353_s18 + $0x10] sm:$0xff] (!%p1402_p9)   ;;  %v1409_v21 = vcombine.low (!%p1402_p9), %v2380_v4, %v2382_v5  ;;  %v1410_v22 = vcombine.low (!%p1402_p9), %v2384_v6, %v2386_v7  ;;  %v1747_v27 = vld [vmem:[%s2353_s18 + $0x8] sm:$0xff] (!%p1402_p9)  }
  0x9f   : > { %352 = sbr.rel (%p1402_p9) target bundleno = 446 (0x1be), region = 56  ;;  %1518 = vmatprep.mubr.bf16.mxu0 (!%p1402_p9), %v1745_v19  ;;  %1522 = vmatprep.mubr.bf16.mxu1 (!%p1402_p9), %v1746_v20  ;;  %v1411_v23 = vcombine.low (!%p1402_p9), %v2388_v8, %v2390_v9  ;;  %v1412_v24 = vcombine.low (!%p1402_p9), %v2392_v10, %v2394_v11  ;;  %v1413_v25 = vcombine.low (!%p1402_p9), %v2396_v12, %v2398_v13  ;;  %v1748_v28 = vld [vmem:[%s2353_s18 + $0x18] sm:$0xff] (!%p1402_p9)   ;;  %v362_v29 = vlaneseq (!%p1402_p9) }
  0xa0   : > { %1502 = vmatprep.subr.bf16.mxu0 (!%p1402_p9), %v1407_v17  ;;  %1606 = vmatprep.subr.bf16.mxu1 (!%p1402_p9), %v1407_v17  ;;  %v1414_v26 = vcombine.low (!%p1402_p9), %v2400_v14, %v2402_v15 }
  0xa1   : > { %1503 = vmatpush3.bf16.xpose.msra.mxu0 (!%p1402_p9), %v1407_v17  ;;  %1614 = vmatpush3.bf16.xpose.msra.mxu1 (!%p1402_p9), %v1407_v17  ;;  %v363_v30 = vshrl.u32 (!%p1402_p9), %v362_v29, 7 }
  0xa2   : > { %1504 = vmatprep.subr.bf16.mxu0 (!%p1402_p9), %v1408_v18  ;;  %1607 = vmatprep.subr.bf16.mxu1 (!%p1402_p9), %v1408_v18 }
  0xa3   : > { %v364_v31 = vsub.s32 (!%p1402_p9), 0, %v363_v30 }
  0xa5   : > { %v365_v32 = vrot.slane (!%p1402_p9), %v2407_v16, %v364_v31 }
  0xa9   : > { %1505 = vmatpush3.bf16.xpose.msra.mxu0 %v1408_v18  ;;  %1615 = vmatpush3.bf16.xpose.msra.mxu1 %v1408_v18 }
  0xaa   : > { %1506 = vmatprep.subr.bf16.mxu0 %v1409_v21  ;;  %1608 = vmatprep.subr.bf16.mxu1 %v1409_v21 }
  0xb1   : > { %1507 = vmatpush3.bf16.xpose.msra.mxu0 %v1409_v21  ;;  %1616 = vmatpush3.bf16.xpose.msra.mxu1 %v1409_v21 }
  0xb2   : > { %1508 = vmatprep.subr.bf16.mxu0 %v1410_v22  ;;  %1609 = vmatprep.subr.bf16.mxu1 %v1410_v22 }
  0xb9   : > { %1509 = vmatpush3.bf16.xpose.msra.mxu0 %v1410_v22  ;;  %1617 = vmatpush3.bf16.xpose.msra.mxu1 %v1410_v22 }
  0xba   : > { %1510 = vmatprep.subr.bf16.mxu0 %v1411_v23  ;;  %1610 = vmatprep.subr.bf16.mxu1 %v1411_v23 }
  0xc1   : > { %1511 = vmatpush3.bf16.xpose.msra.mxu0 %v1411_v23  ;;  %1618 = vmatpush3.bf16.xpose.msra.mxu1 %v1411_v23 }
  0xc2   : > { %1512 = vmatprep.subr.bf16.mxu0 %v1412_v24  ;;  %1611 = vmatprep.subr.bf16.mxu1 %v1412_v24 }
  0xc9   : > { %1513 = vmatpush3.bf16.xpose.msra.mxu0 %v1412_v24  ;;  %1619 = vmatpush3.bf16.xpose.msra.mxu1 %v1412_v24 }
  0xca   : > { %1514 = vmatprep.subr.bf16.mxu0 %v1413_v25  ;;  %1612 = vmatprep.subr.bf16.mxu1 %v1413_v25 }
  0xd1   : > { %1515 = vmatpush3.bf16.xpose.msra.mxu0 %v1413_v25  ;;  %1620 = vmatpush3.bf16.xpose.msra.mxu1 %v1413_v25 }
  0xd2   : > { %1516 = vmatprep.subr.bf16.mxu0 %v1414_v26  ;;  %1613 = vmatprep.subr.bf16.mxu1 %v1414_v26 }
  0xd9   : > { %1517 = vmatpush3.bf16.xpose.msra.mxu0 %v1414_v26  ;;  %1621 = vmatpush3.bf16.xpose.msra.mxu1 %v1414_v26 }
  0xe0   : > { %1519 = vmatmul.mubr.bf16.vlgmr.msra.gmra.mrb[0].mxu0 %v1747_v27  ;;  %1523 = vmatmul.mubr.bf16.vlgmr.msra.gmra.mrb[0].mxu1 %v1748_v28 }
 0x1b3   : > { %v1520_v33 = vpop.f32.mrb[0].mxu0  ;;  %v1524_v34 = vpop.f32.mrb[0].mxu1 }
 0x1b4   : > { %v482_v35 = vadd.f32 %v1520_v33, %v365_v32  ;;  %v498_v36 = vadd.f32 %v1524_v34, %v365_v32  ;;  %v473_v37 = vpop.f32.mrb[1].mxu0  ;;  %v489_v38 = vpop.f32.mrb[1].mxu1 }
 0x1b5   : > { %v474_v39 = vadd.f32 %v473_v37, %v365_v32  ;;  %v490_v40 = vadd.f32 %v489_v38, %v365_v32  ;;  %v1521_v41 = vpop.f32.mrb[2].mxu0  ;;  %v1525_v42 = vpop.f32.mrb[2].mxu1 }
 0x1b6   : > { %v485_v43 = vadd.f32 %v1521_v41, %v365_v32  ;;  %v501_v44 = vadd.f32 %v1525_v42, %v365_v32  ;;  %v476_v45 = vpop.f32.mrb[3].mxu0  ;;  %v492_v46 = vpop.f32.mrb[3].mxu1  ;;  %v506_v49 = vmax.f32 %v482_v35, 0.0  ;;  %v510_v50 = vmax.f32 %v498_v36, 0.0 }
 0x1b7   : > { %v477_v47 = vadd.f32 %v476_v45, %v365_v32  ;;  %v493_v48 = vadd.f32 %v492_v46, %v365_v32  ;;  %v504_v53 = vmax.f32 %v474_v39, 0.0  ;;  %v508_v54 = vmax.f32 %v490_v40, 0.0 }
 0x1b8   : > { %v507_v51 = vmax.f32 %v485_v43, 0.0  ;;  %v511_v52 = vmax.f32 %v501_v44, 0.0 }
 0x1b9   : > { %v505_v55 = vmax.f32 %v477_v47, 0.0  ;;  %v509_v56 = vmax.f32 %v493_v48, 0.0 }
 0x1ba   : > { %v513_v57 = vpack.c.bf16 %v507_v51, %v506_v49  ;;  %v515_v58 = vpack.c.bf16 %v511_v52, %v510_v50 }
 0x1bb   : > { %v512_v59 = vpack.c.bf16 %v505_v55, %v504_v53  ;;  %v514_v60 = vpack.c.bf16 %v509_v56, %v508_v54 }
 0x1bc   : > { %517 = vst [vmem:[#allocation2 + $0x8] sm:$0xff] %v513_v57  ;;  %519 = vst [vmem:[#allocation2 + $0x18] sm:$0xff] %v515_v58 }
 0x1bd   : > { %516 = vst [vmem:[#allocation2] sm:$0xff] %v512_v59  ;;  %518 = vst [vmem:[#allocation2 + $0x10] sm:$0xff] %v514_v60 }
 0x1be PF: > { %v1423_v61 = vcombine.low %v2372_v0, %v2374_v1  ;;  %v1424_v62 = vcombine.low %v2376_v2, %v2378_v3  ;;  %v1749_v63 = vld [vmem:[%s2345_s12] sm:$0xff]   ;;  %v1425_v17 = vcombine.low %v2380_v4, %v2382_v5  ;;  %v1426_v0 = vcombine.low %v2384_v6, %v2386_v7  ;;  %v1750_v6 = vld [vmem:[%s2345_s12 + $0x8] sm:$0xff]   ;;  %v1751_v7 = vld [vmem:[%s2345_s12 + $0x10] sm:$0xff]   ;;  %s2803_s21 = sld [smem:[#allocation15_spill]]  ;;  %s1445_s15 = sshll.u32 %s2031_s25, 5 }
 0x1bf   : > { %1542 = vmatprep.mubr.bf16.mxu0 %v1749_v63  ;;  %v1427_v2 = vcombine.low %v2388_v8, %v2390_v9  ;;  %v1428_v3 = vcombine.low %v2392_v10, %v2394_v11  ;;  %v1429_v4 = vcombine.low %v2396_v12, %v2398_v13  ;;  %v1430_v5 = vcombine.low %v2400_v14, %v2402_v15  ;;  %v1752_v8 = vld [vmem:[%s2345_s12 + $0x18] sm:$0xff]   ;;  %v1753_v9 = vld [vmem:[%s2345_s12 + $0x20] sm:$0xff]   ;;  %v1754_v10 = vld [vmem:[%s2345_s12 + $0x28] sm:$0xff]   ;;  %s1254_s5 = sshll.u32 %s2409_s4, 4  ;;  %s2805_s3 = sld [smem:[#allocation23_spill]]  ;;  %s2679_s5 = int_to_ptr.vmem [resolvable:$true] %s1254_s5 }
 0x1c0   : > { %1526 = vmatprep.subr.bf16.mxu0 %v1423_v61  ;;  %v1755_v11 = vld [vmem:[%s2345_s12 + $0x30] sm:$0xff]   ;;  %v1756_v12 = vld [vmem:[%s2345_s12 + $0x38] sm:$0xff]   ;;  %v537_v14 = vlaneseq  ;;  %vm884_vm2 = vcmask 523264   ;;  %s1239_s29 = scalar_lea.sflag [#allocation5], %s2341_s16  ;;  %s1913_s7 = scalar_lea.vmem %s2679_s5, 2048 }
 0x1c1   : > { %1527 = vmatpush3.bf16.xpose.msra.mxu0 %v1423_v61  ;;  %p1914_p1 = scmp.ne.s32.totalorder %s2679_s5, %s1913_s7  ;;  %s2051_s13 = smov [#allocation9]  }
 0x1c2   : > { %1528 = vmatprep.subr.bf16.mxu0 %v1424_v62  ;;  %v2457_v15 = vshrl.u32 %v537_v14, 7  ;;  %s1917_s24 = sshll.u32 %s2051_s13, 4  ;;  %s1918_s24 = int_to_ptr.vmem [resolvable:$false] %s1917_s24 }
 0x1c3   : > { %v760_v19 = vld [vmem:[#allocation2 + $0x8] sm:$0xff]  ;;  %v762_v13 = vld [vmem:[#allocation2 + $0x18] sm:$0xff]  ;;  %p1915_p12 = pnand %p1914_p1, %p2208_p10  ;;  %s1919_s17 = scalar_lea.vmem %s1918_s24, 4096 }
 0x1c4   : > { %v759_v18 = vld [vmem:[#allocation2] sm:$0xff]  ;;  %v761_v1 = vld [vmem:[#allocation2 + $0x10] sm:$0xff]  ;;  %v539_v20 = vsub.s32 0, %v2457_v15  ;;  %s1444_s2 = sshll.u32 %s2803_s21, 4  ;;  %p1920_p3 = scmp.lt.s32.totalorder %s2679_s5, %s1918_s24 }
 0x1c5   : > { %1558 = vmatprep.subr.bf16.mxu1 %v759_v18  ;;  %p1916_p7 = pneg %p1915_p12  ;;  %p1921_p6 = scmp.lt.s32.totalorder %s1919_s17, %s1913_s7 }
 0x1c6   : > { %1559 = vmatpush3.bf16.xpose.msra.mxu1 %v759_v18  ;;  %v540_v21 = vrot.slane %v2407_v16, %v539_v20 }
 0x1c7   : > { %1560 = vmatprep.subr.bf16.mxu1 %v760_v19  ;;  %p1922_p8 = por %p1921_p6, %p1920_p3 }
 0x1c9   : > { %1529 = vmatpush3.bf16.xpose.msra.mxu0 %v1424_v62  ;;  %p1923_p2 = pnand %p1922_p8, %p1916_p7 }
 0x1ca   : > { %1530 = vmatprep.subr.bf16.mxu0 %v1425_v17 }
 0x1ce   : > { %1561 = vmatpush3.bf16.xpose.msra.mxu1 %v760_v19 }
 0x1cf   : > { %1562 = vmatprep.subr.bf16.mxu1 %v761_v1 }
 0x1d1   : > { %1531 = vmatpush3.bf16.xpose.msra.mxu0 %v1425_v17 }
 0x1d2   : > { %1532 = vmatprep.subr.bf16.mxu0 %v1426_v0 }
 0x1d6   : > { %1563 = vmatpush3.bf16.xpose.msra.mxu1 %v761_v1 }
 0x1d7   : > { %1564 = vmatprep.subr.bf16.mxu1 %v762_v13 }
 0x1d9   : > { %1533 = vmatpush3.bf16.xpose.msra.mxu0 %v1426_v0 }
 0x1da   : > { %1534 = vmatprep.subr.bf16.mxu0 %v1427_v2 }
 0x1de   : > { %1565 = vmatpush3.bf16.xpose.msra.mxu1 %v762_v13 }
 0x1e1   : > { %1535 = vmatpush3.bf16.xpose.msra.mxu0 %v1427_v2 }
 0x1e2   : > { %1536 = vmatprep.subr.bf16.mxu0 %v1428_v3 }
 0x1e9   : > { %1537 = vmatpush3.bf16.xpose.msra.mxu0 %v1428_v3 }
 0x1ea   : > { %1538 = vmatprep.subr.bf16.mxu0 %v1429_v4 }
 0x1f1   : > { %1539 = vmatpush3.bf16.xpose.msra.mxu0 %v1429_v4 }
 0x1f2   : > { %1540 = vmatprep.subr.bf16.mxu0 %v1430_v5 }
 0x1f9   : > { %1541 = vmatpush3.bf16.xpose.msra.mxu0 %v1430_v5 }
 0x200   : > { %1543 = vmatmul.mubr.bf16.vlgmr.msra.gmra.mrb[0].mxu0 %v1750_v6 }
 0x201   : > { %1546 = vmatprep.mubr.bf16.mxu0 %v1751_v7 }
 0x208   : > { %1547 = vmatmul.mubr.bf16.gmra.mrb[4].mxu0 %v1752_v8 }
 0x209   : > { %1550 = vmatprep.mubr.bf16.mxu0 %v1753_v9 }
 0x210   : > { %1551 = vmatmul.mubr.bf16.gmra.mrb[8].mxu0 %v1754_v10  ;;  %v860_v10 = vld [vmem:[%s329_s11] sm:$0x1] }
 0x211   : > { %1554 = vmatprep.mubr.bf16.mxu0 %v1755_v11  ;;  %vm861_vm0 = vcmp.gt.f32.partialorder %v860_v10, 0.5  ;;  %v2050_v11 = vmov 0  }
 0x218   : > { %1555 = vmatmul.mubr.bf16.gmra.mrb[12].mxu0 %v1756_v12  ;;  %v862_v12 = vsel %vm861_vm0, 1, %v2050_v11 }
 0x219   : > { %v866_v13 = vrot.slane %v862_v12, %v539_v20 }
 0x21b   : > { %vm867_vm1 = vcmp.eq.s32.totalorder %v866_v13, 1 }
 0x2d3   : > { %v1544_v22 = vpop.f32.mrb[0].mxu0 }
 0x2d4   : > { %v681_v23 = vadd.f32 %v1544_v22, %v540_v21  ;;  %v672_v24 = vpop.f32.mrb[1].mxu0 }
 0x2d5   : > { %v673_v25 = vadd.f32 %v672_v24, %v540_v21  ;;  %v1545_v26 = vpop.f32.mrb[2].mxu0 }
 0x2d6   : > { %v684_v27 = vadd.f32 %v1545_v26, %v540_v21  ;;  %v675_v28 = vpop.f32.mrb[3].mxu0  ;;  %v737_v30 = vmax.f32 %v681_v23, 0.0 }
 0x2d7   : > { %v676_v29 = vadd.f32 %v675_v28, %v540_v21  ;;  %v735_v32 = vmax.f32 %v673_v25, 0.0 }
 0x2d8   : > { %v738_v31 = vmax.f32 %v684_v27, 0.0 }
 0x2d9   : > { %v736_v33 = vmax.f32 %v676_v29, 0.0 }
 0x2da   : > { %v752_v34 = vpack.c.bf16 %v738_v31, %v737_v30 }
 0x2db   : > { %v1548_v35 = vpop.f32.mrb[4].mxu0  ;;  %v751_v36 = vpack.c.bf16 %v736_v33, %v735_v32 }
 0x2dc   : > { %v697_v37 = vadd.f32 %v1548_v35, %v540_v21  ;;  %v688_v38 = vpop.f32.mrb[5].mxu0 }
 0x2dd   : > { %v689_v39 = vadd.f32 %v688_v38, %v540_v21  ;;  %v1549_v40 = vpop.f32.mrb[6].mxu0  ;;  %1566 = vmatprep.mubr.bf16.mxu1 %v751_v36 }
 0x2de   : > { %v741_v16 = vmax.f32 %v697_v37, 0.0  ;;  %v700_v41 = vadd.f32 %v1549_v40, %v540_v21  ;;  %v691_v42 = vpop.f32.mrb[7].mxu0  ;;  %1567 = vmatmul.mubr.bf16.vlgmr.msra.gmra.mrb[0].mxu1 %v752_v34 }
 0x2df   : > { %v739_v43 = vmax.f32 %v689_v39, 0.0  ;;  %v692_v44 = vadd.f32 %v691_v42, %v540_v21 }
 0x2e0   : > { %v742_v45 = vmax.f32 %v700_v41, 0.0 }
 0x2e1   : > { %v740_v46 = vmax.f32 %v692_v44, 0.0 }
 0x2e2   : > { %v754_v47 = vpack.c.bf16 %v742_v45, %v741_v16 }
 0x2e3   : > { %v753_v48 = vpack.c.bf16 %v740_v46, %v739_v43  ;;  %v1552_v49 = vpop.f32.mrb[8].mxu0 }
 0x2e4   : > { %v713_v50 = vadd.f32 %v1552_v49, %v540_v21  ;;  %v704_v51 = vpop.f32.mrb[9].mxu0 }
 0x2e5   : > { %v705_v52 = vadd.f32 %v704_v51, %v540_v21  ;;  %v1553_v53 = vpop.f32.mrb[10].mxu0  ;;  %1570 = vmatprep.mubr.bf16.mxu1 %v753_v48 }
 0x2e6   : > { %v745_v54 = vmax.f32 %v713_v50, 0.0  ;;  %v716_v55 = vadd.f32 %v1553_v53, %v540_v21  ;;  %v707_v56 = vpop.f32.mrb[11].mxu0  ;;  %1571 = vmatmul.mubr.bf16.gmra.mrb[4].mxu1 %v754_v47 }
 0x2e7   : > { %v743_v57 = vmax.f32 %v705_v52, 0.0  ;;  %v708_v58 = vadd.f32 %v707_v56, %v540_v21 }
 0x2e8   : > { %v746_v59 = vmax.f32 %v716_v55, 0.0 }
 0x2e9   : > { %v744_v60 = vmax.f32 %v708_v58, 0.0 }
 0x2ea   : > { %v756_v61 = vpack.c.bf16 %v746_v59, %v745_v54 }
 0x2eb   : > { %v755_v62 = vpack.c.bf16 %v744_v60, %v743_v57  ;;  %v1556_v63 = vpop.f32.mrb[12].mxu0 }
 0x2ec   : > { %v729_v17 = vadd.f32 %v1556_v63, %v540_v21  ;;  %v720_v18 = vpop.f32.mrb[13].mxu0 }
 0x2ed   : > { %v721_v19 = vadd.f32 %v720_v18, %v540_v21  ;;  %v1557_v0 = vpop.f32.mrb[14].mxu0  ;;  %1574 = vmatprep.mubr.bf16.mxu1 %v755_v62  ;;  %v1757_v18 = vld [vmem:[%s2353_s18] sm:$0xff]  }
 0x2ee   : > { %v749_v1 = vmax.f32 %v729_v17, 0.0  ;;  %v732_v2 = vadd.f32 %v1557_v0, %v540_v21  ;;  %v723_v3 = vpop.f32.mrb[15].mxu0  ;;  %1575 = vmatmul.mubr.bf16.gmra.mrb[8].mxu1 %v756_v61  ;;  %1582 = vmatprep.subr.bf16.mxu1 %v1757_v18 }
 0x2ef   : > { %v747_v4 = vmax.f32 %v721_v19, 0.0  ;;  %v724_v5 = vadd.f32 %v723_v3, %v540_v21  ;;  %v1758_v19 = vld [vmem:[%s2353_s18 + $0x8] sm:$0xff]   ;;  %1583 = vmatpush3.bf16.msra.mxu1 %v1757_v18 }
 0x2f0   : > { %v750_v6 = vmax.f32 %v732_v2, 0.0  ;;  %1584 = vmatprep.subr.bf16.mxu1 %v1758_v19 }
 0x2f1   : > { %v748_v7 = vmax.f32 %v724_v5, 0.0 }
 0x2f2   : > { %v758_v8 = vpack.c.bf16 %v750_v6, %v749_v1 }
 0x2f3   : > { %v757_v9 = vpack.c.bf16 %v748_v7, %v747_v4  ;;  %1585 = vmatpush3.bf16.msra.mxu1 %v1758_v19 }
 0x2f5   : > { %1578 = vmatprep.mubr.bf16.mxu1 %v757_v9 }
 0x2f6   : > { %1579 = vmatmul.mubr.bf16.gmra.mrb[12].mxu1 %v758_v8 }
 0x3b1   : > { %v1568_v14 = vpop.f32.mrb[0].mxu1 }
 0x3b2   : > { %v2471_v21 = vsel %vm867_vm1, -1e+30, %v1568_v14  ;;  %v797_v22 = vpop.f32.mrb[1].mxu1 }
 0x3b3   : > { %v2474_v23 = vsel %vm867_vm1, -1e+30, %v797_v22  ;;  %v1569_v24 = vpop.f32.mrb[2].mxu1  ;;  %v891_v25 = vsel %vm884_vm2, %v2471_v21, -inf }
 0x3b4   : > { %v2479_v26 = vsel %vm867_vm1, -1e+30, %v1569_v24  ;;  %892 = vmax.xlane.f32.xlu1 %v891_v25  ;;  %v800_v15 = vpop.f32.mrb[3].mxu1  ;;  %v885_v20 = vsel %vm884_vm2, %v2474_v23, -inf }
 0x3b5   : > { %v2484_v27 = vsel %vm867_vm1, -1e+30, %v800_v15  ;;  %886 = vmax.xlane.f32.xlu0 %v885_v20  ;;  %v894_v28 = vsel %vm884_vm2, %v2479_v26, -inf }
 0x3b6   : > { %v888_v29 = vsel %vm884_vm2, %v2484_v27, -inf }
 0x3b8   : > { %895 = vmax.xlane.f32.xlu1 %v894_v28 }
 0x3b9   : > { %889 = vmax.xlane.f32.xlu0 %v888_v29  ;;  %v1572_v30 = vpop.f32.mrb[4].mxu1 }
 0x3ba   : > { %v813_v31 = vpop.f32.mrb[5].mxu1  ;;  %v2496_v36 = vsel %vm867_vm1, -1e+30, %v1572_v30 }
 0x3bb   : > { %v2491_v32 = vsel %vm867_vm1, -1e+30, %v813_v31  ;;  %v1573_v33 = vpop.f32.mrb[6].mxu1  ;;  %v903_v40 = vsel %vm884_vm2, %v2496_v36, -inf }
 0x3bc   : > { %v816_v34 = vpop.f32.mrb[7].mxu1  ;;  %v897_v35 = vsel %vm884_vm2, %v2491_v32, -inf  ;;  %v2504_v39 = vsel %vm867_vm1, -1e+30, %v1573_v33 }
 0x3bd   : > { %v2499_v37 = vsel %vm867_vm1, -1e+30, %v816_v34  ;;  %898 = vmax.xlane.f32.xlu0 %v897_v35  ;;  %v906_v42 = vsel %vm884_vm2, %v2504_v39, -inf }
 0x3be   : > { %v900_v38 = vsel %vm884_vm2, %v2499_v37, -inf }
 0x3bf   : > { %901 = vmax.xlane.f32.xlu1 %v900_v38 }
 0x3c1   : > { %904 = vmax.xlane.f32.xlu0 %v903_v40  ;;  %v1576_v16 = vpop.f32.mrb[8].mxu1 }
 0x3c2   : > { %v829_v41 = vpop.f32.mrb[9].mxu1  ;;  %v2516_v47 = vsel %vm867_vm1, -1e+30, %v1576_v16 }
 0x3c3   : > { %v2511_v43 = vsel %vm867_vm1, -1e+30, %v829_v41  ;;  %907 = vmax.xlane.f32.xlu1 %v906_v42  ;;  %v1577_v44 = vpop.f32.mrb[10].mxu1  ;;  %v915_v51 = vsel %vm884_vm2, %v2516_v47, -inf }
 0x3c4   : > { %v832_v45 = vpop.f32.mrb[11].mxu1  ;;  %v909_v46 = vsel %vm884_vm2, %v2511_v43, -inf  ;;  %v2524_v50 = vsel %vm867_vm1, -1e+30, %v1577_v44 }
 0x3c5   : > { %v2519_v48 = vsel %vm867_vm1, -1e+30, %v832_v45  ;;  %910 = vmax.xlane.f32.xlu0 %v909_v46  ;;  %v918_v54 = vsel %vm884_vm2, %v2524_v50, -inf }
 0x3c6   : > { %v912_v49 = vsel %vm884_vm2, %v2519_v48, -inf }
 0x3c7   : > { %913 = vmax.xlane.f32.xlu1 %v912_v49 }
 0x3c9   : > { %916 = vmax.xlane.f32.xlu0 %v915_v51  ;;  %v1580_v52 = vpop.f32.mrb[12].mxu1 }
 0x3ca   : > { %v845_v53 = vpop.f32.mrb[13].mxu1  ;;  %v2536_v59 = vsel %vm867_vm1, -1e+30, %v1580_v52 }
 0x3cb   : > { %v2531_v55 = vsel %vm867_vm1, -1e+30, %v845_v53  ;;  %919 = vmax.xlane.f32.xlu1 %v918_v54  ;;  %v1581_v56 = vpop.f32.mrb[14].mxu1  ;;  %v927_v63 = vsel %vm884_vm2, %v2536_v59, -inf }
 0x3cc   : > { %v848_v57 = vpop.f32.mrb[15].mxu1  ;;  %v921_v58 = vsel %vm884_vm2, %v2531_v55, -inf  ;;  %v2544_v62 = vsel %vm867_vm1, -1e+30, %v1581_v56 }
 0x3cd   : > { %v2539_v60 = vsel %vm867_vm1, -1e+30, %v848_v57  ;;  %922 = vmax.xlane.f32.xlu0 %v921_v58  ;;  %v930_v17 = vsel %vm884_vm2, %v2544_v62, -inf }
 0x3ce   : > { %v924_v61 = vsel %vm884_vm2, %v2539_v60, -inf }
 0x3cf   : > { %925 = vmax.xlane.f32.xlu1 %v924_v61 }
 0x3d1   : > { %928 = vmax.xlane.f32.xlu0 %v927_v63 }
 0x3d3   : > { %931 = vmax.xlane.f32.xlu1 %v930_v17 }
 0x441   : > { %v893_v0 = vpop.xlane.xlu1 %892 }
 0x442   : > { %v935_v1 = vsub.f32 %v2471_v21, %v893_v0  ;;  %v887_v2 = vpop.xlane.xlu0 %886 }
 0x443   : > { %v933_v3 = vsub.f32 %v2474_v23, %v887_v2 }
 0x444   : > { %v953_v4 = vmul.f32 1.442695, %v935_v1 }
 0x445   : > { %v949_v5 = vmul.f32 1.442695, %v933_v3  ;;  %v896_v6 = vpop.xlane.xlu1 %895 }
 0x446   : > { %v936_v7 = vsub.f32 %v2479_v26, %v896_v6  ;;  %v890_v8 = vpop.xlane.xlu0 %889 }
 0x447   : > { %1761 = vpow2.f32 %v949_v5  ;;  %v934_v9 = vsub.f32 %v2484_v27, %v890_v8 }
 0x448   : > { %1763 = vpow2.f32 %v953_v4  ;;  %v955_v10 = vmul.f32 1.442695, %v936_v7 }
 0x449   : > { %v951_v11 = vmul.f32 1.442695, %v934_v9 }
 0x44a   : > { %v899_v12 = vpop.xlane.xlu0 %898 }
 0x44b   : > { %1765 = vpow2.f32 %v951_v11  ;;  %v937_v13 = vsub.f32 %v2491_v32, %v899_v12 }
 0x44c   : > { %v902_v14 = vpop.xlane.xlu1 %901  ;;  %1767 = vpow2.f32 %v955_v10 }
 0x44d   : > { %v957_v21 = vmul.f32 1.442695, %v937_v13  ;;  %v938_v22 = vsub.f32 %v2499_v37, %v902_v14 }
 0x44e   : > { %v905_v23 = vpop.xlane.xlu0 %904 }
 0x44f   : > { %1769 = vpow2.f32 %v957_v21  ;;  %v959_v24 = vmul.f32 1.442695, %v938_v22  ;;  %v939_v25 = vsub.f32 %v2496_v36, %v905_v23  ;;  %v1759_v21 = vld [vmem:[%s2353_s18 + $0x10] sm:$0xff]   ;;  %v1760_v23 = vld [vmem:[%s2353_s18 + $0x18] sm:$0xff]   ;;  %s1251_s18 = sadd.s32 %s1445_s15, %s1444_s2 }
 0x450   : > { %v908_v26 = vpop.xlane.xlu1 %907  ;;  %1586 = vmatprep.subr.bf16.mxu1 %v1759_v21  ;;  %s1446_s10 = sshll.u32 %s1251_s18, 7 }
 0x451   : > { %v2559_v15 = vpop.eup %1761  ;;  %1771 = vpow2.f32 %v959_v24  ;;  %v961_v20 = vmul.f32 1.442695, %v939_v25  ;;  %v940_v27 = vsub.f32 %v2504_v39, %v908_v26  ;;  %1587 = vmatpush3.bf16.msra.mxu1 %v1759_v21  ;;  %s2677_s11 = scalar_lea.hbm %s2805_s3, %s1446_s10 }
 0x452   : > { %v911_v28 = vpop.xlane.xlu0 %910  ;;  %v981_v29 = vsel %vm884_vm2, %v2559_v15, 0.0  ;;  %v2564_v30 = vpop.eup %1763  ;;  %1588 = vmatprep.subr.bf16.mxu1 %v1760_v23 }
 0x453   : > { %1773 = vpow2.f32 %v961_v20  ;;  %v963_v31 = vmul.f32 1.442695, %v940_v27  ;;  %v941_v32 = vsub.f32 %v2511_v43, %v911_v28  ;;  %982 = vadd.xlane.f32.xlu0 %v981_v29  ;;  %v987_v38 = vsel %vm884_vm2, %v2564_v30, 0.0 }
 0x454   : > { %v914_v33 = vpop.xlane.xlu1 %913 }
 0x455   : > { %v2567_v34 = vpop.eup %1765  ;;  %1775 = vpow2.f32 %v963_v31  ;;  %v965_v35 = vmul.f32 1.442695, %v941_v32  ;;  %v942_v36 = vsub.f32 %v2519_v48, %v914_v33  ;;  %1589 = vmatpush3.bf16.msra.mxu1 %v1760_v23 }
 0x456   : > { %v917_v37 = vpop.xlane.xlu0 %916  ;;  %v984_v39 = vsel %vm884_vm2, %v2567_v34, 0.0  ;;  %v2574_v40 = vpop.eup %1767 }
 0x457   : > { %1777 = vpow2.f32 %v965_v35  ;;  %v967_v16 = vmul.f32 1.442695, %v942_v36  ;;  %v943_v41 = vsub.f32 %v2516_v47, %v917_v37  ;;  %988 = vadd.xlane.f32.xlu0 %v987_v38  ;;  %985 = vadd.xlane.f32.xlu1 %v984_v39  ;;  %v990_v49 = vsel %vm884_vm2, %v2574_v40, 0.0 }
 0x458   : > { %v920_v42 = vpop.xlane.xlu1 %919 }
 0x459   : > { %v2577_v43 = vpop.eup %1769  ;;  %1779 = vpow2.f32 %v967_v16  ;;  %v969_v44 = vmul.f32 1.442695, %v943_v41  ;;  %v944_v45 = vsub.f32 %v2524_v50, %v920_v42 }
 0x45a   : > { %v923_v46 = vpop.xlane.xlu0 %922  ;;  %v993_v48 = vsel %vm884_vm2, %v2577_v43, 0.0 }
 0x45b   : > { %v2584_v51 = vpop.eup %1771  ;;  %1781 = vpow2.f32 %v969_v44  ;;  %v971_v47 = vmul.f32 1.442695, %v944_v45  ;;  %v945_v52 = vsub.f32 %v2531_v55, %v923_v46  ;;  %994 = vadd.xlane.f32.xlu0 %v993_v48  ;;  %991 = vadd.xlane.f32.xlu1 %v990_v49 }
 0x45c   : > { %v926_v53 = vpop.xlane.xlu1 %925  ;;  %v996_v61 = vsel %vm884_vm2, %v2584_v51, 0.0 }
 0x45d   : > { %v2587_v54 = vpop.eup %1773  ;;  %1783 = vpow2.f32 %v971_v47  ;;  %v973_v50 = vmul.f32 1.442695, %v945_v52  ;;  %v946_v56 = vsub.f32 %v2539_v60, %v926_v53 }
 0x45e   : > { %v929_v57 = vpop.xlane.xlu0 %928  ;;  %v999_v58 = vsel %vm884_vm2, %v2587_v54, 0.0 }
 0x45f   : > { %v2594_v63 = vpop.eup %1775  ;;  %1785 = vpow2.f32 %v973_v50  ;;  %v975_v55 = vmul.f32 1.442695, %v946_v56  ;;  %v947_v17 = vsub.f32 %v2536_v59, %v929_v57  ;;  %1000 = vadd.xlane.f32.xlu0 %v999_v58  ;;  %997 = vadd.xlane.f32.xlu1 %v996_v61 }
 0x460   : > { %v932_v18 = vpop.xlane.xlu1 %931  ;;  %v1002_v2 = vsel %vm884_vm2, %v2594_v63, 0.0 }
 0x461   : > { %v2597_v19 = vpop.eup %1777  ;;  %1787 = vpow2.f32 %v975_v55  ;;  %v977_v60 = vmul.f32 1.442695, %v947_v17  ;;  %v948_v0 = vsub.f32 %v2544_v62, %v932_v18 }
 0x462   : > { %v1005_v1 = vsel %vm884_vm2, %v2597_v19, 0.0 }
 0x463   : > { %v2604_v3 = vpop.eup %1779  ;;  %1789 = vpow2.f32 %v977_v60  ;;  %v979_v4 = vmul.f32 1.442695, %v948_v0  ;;  %1006 = vadd.xlane.f32.xlu0 %v1005_v1  ;;  %1003 = vadd.xlane.f32.xlu1 %v1002_v2 }
 0x464   : > { %v1008_v62 = vsel %vm884_vm2, %v2604_v3, 0.0 }
 0x465   : > { %v2606_v59 = vpop.eup %1781  ;;  %1791 = vpow2.f32 %v979_v4 }
 0x466   : > { %v1011_v5 = vsel %vm884_vm2, %v2606_v59, 0.0 }
 0x467   : > { %v2612_v6 = vpop.eup %1783  ;;  %1012 = vadd.xlane.f32.xlu0 %v1011_v5  ;;  %1009 = vadd.xlane.f32.xlu1 %v1008_v62 }
 0x468   : > { %v1014_v9 = vsel %vm884_vm2, %v2612_v6, 0.0 }
 0x469   : > { %v2614_v7 = vpop.eup %1785 }
 0x46a   : > { %v1017_v8 = vsel %vm884_vm2, %v2614_v7, 0.0 }
 0x46b   : > { %v2620_v10 = vpop.eup %1787  ;;  %1018 = vadd.xlane.f32.xlu0 %v1017_v8  ;;  %1015 = vadd.xlane.f32.xlu1 %v1014_v9 }
 0x46c   : > { %v1020_v13 = vsel %vm884_vm2, %v2620_v10, 0.0 }
 0x46d   : > { %v2622_v11 = vpop.eup %1789 }
 0x46e   : > { %v1023_v12 = vsel %vm884_vm2, %v2622_v11, 0.0 }
 0x46f   : > { %v2628_v14 = vpop.eup %1791  ;;  %1024 = vadd.xlane.f32.xlu0 %v1023_v12  ;;  %1021 = vadd.xlane.f32.xlu1 %v1020_v13 }
 0x470   : > { %v1026_v22 = vsel %vm884_vm2, %v2628_v14, 0.0 }
 0x473   : > { %1027 = vadd.xlane.f32.xlu1 %v1026_v22 }
 0x4e0   : > { %v983_v24 = vpop.xlane.xlu0 %982 }
 0x4e1   : > { %1793 = vrcp.f32 %v983_v24 }
 0x4e4   : > { %v989_v25 = vpop.xlane.xlu0 %988  ;;  %v986_v26 = vpop.xlane.xlu1 %985 }
 0x4e5   : > { %1795 = vrcp.f32 %v986_v26 }
 0x4e6   : > { %1797 = vrcp.f32 %v989_v25 }
 0x4e8   : > { %v995_v20 = vpop.xlane.xlu0 %994  ;;  %v992_v27 = vpop.xlane.xlu1 %991 }
 0x4e9   : > { %1799 = vrcp.f32 %v992_v27 }
 0x4ea   : > { %1801 = vrcp.f32 %v995_v20 }
 0x4eb   : > { %v1794_v31 = vpop.eup %1793 }
 0x4ec   : > { %v1001_v28 = vpop.xlane.xlu0 %1000  ;;  %v998_v29 = vpop.xlane.xlu1 %997  ;;  %v1045_v36 = vmul.f32 %v1794_v31, %v2559_v15 }
 0x4ed   : > { %1803 = vrcp.f32 %v998_v29 }
 0x4ee   : > { %1805 = vrcp.f32 %v1001_v28 }
 0x4ef   : > { %v1796_v32 = vpop.eup %1795 }
 0x4f0   : > { %v1007_v33 = vpop.xlane.xlu0 %1006  ;;  %v1004_v35 = vpop.xlane.xlu1 %1003  ;;  %v1046_v37 = vmul.f32 %v1796_v32, %v2567_v34 }
 0x4f1   : > { %v1798_v38 = vpop.eup %1797  ;;  %1807 = vrcp.f32 %v1004_v35 }
 0x4f2   : > { %v1061_v39 = vpack.c.bf16 %v1046_v37, %v1045_v36  ;;  %1809 = vrcp.f32 %v1007_v33  ;;  %v1047_v44 = vmul.f32 %v1798_v38, %v2564_v30 }
 0x4f3   : > { %v1800_v16 = vpop.eup %1799 }
 0x4f4   : > { %v1013_v41 = vpop.xlane.xlu0 %1012  ;;  %v1010_v42 = vpop.xlane.xlu1 %1009  ;;  %v1048_v45 = vmul.f32 %v1800_v16, %v2574_v40  ;;  %1590 = vmatprep.mubr.msk.bf16.mxu1 %vm884_vm2, %v1061_v39 }
 0x4f5   : > { %v1802_v46 = vpop.eup %1801  ;;  %1811 = vrcp.f32 %v1010_v42 }
 0x4f6   : > { %v1062_v48 = vpack.c.bf16 %v1048_v45, %v1047_v44  ;;  %1813 = vrcp.f32 %v1013_v41  ;;  %v1049_v47 = vmul.f32 %v1802_v46, %v2577_v43 }
 0x4f7   : > { %v1804_v49 = vpop.eup %1803 }
 0x4f8   : > { %v1019_v15 = vpop.xlane.xlu0 %1018  ;;  %v1016_v34 = vpop.xlane.xlu1 %1015  ;;  %1591 = vmatmul.mubr.msk.bf16.vlgmr.msra.gmra.mrb[16].mxu1 %vm884_vm2, %v1062_v48  ;;  %v1050_v52 = vmul.f32 %v1804_v49, %v2584_v51 }
 0x4f9   : > { %v1806_v53 = vpop.eup %1805  ;;  %1815 = vrcp.f32 %v1016_v34 }
 0x4fa   : > { %v1063_v30 = vpack.c.bf16 %v1050_v52, %v1049_v47  ;;  %1817 = vrcp.f32 %v1019_v15  ;;  %v1051_v57 = vmul.f32 %v1806_v53, %v2587_v54 }
 0x4fb   : > { %v1808_v50 = vpop.eup %1807 }
 0x4fc   : > { %v1025_v40 = vpop.xlane.xlu0 %1024  ;;  %v1022_v56 = vpop.xlane.xlu1 %1021  ;;  %1594 = vmatprep.mubr.msk.bf16.mxu1 %vm884_vm2, %v1063_v30  ;;  %v1052_v58 = vmul.f32 %v1808_v50, %v2594_v63 }
 0x4fd   : > { %v1810_v61 = vpop.eup %1809  ;;  %1819 = vrcp.f32 %v1022_v56 }
 0x4fe   : > { %1821 = vrcp.f32 %v1025_v40  ;;  %v1064_v55 = vpack.c.bf16 %v1052_v58, %v1051_v57  ;;  %v1053_v51 = vmul.f32 %v1810_v61, %v2597_v19 }
 0x4ff   : > { %v1812_v43 = vpop.eup %1811 }
 0x500   : > { %v1028_v17 = vpop.xlane.xlu1 %1027  ;;  %1595 = vmatmul.mubr.msk.bf16.gmra.mrb[20].mxu1 %vm884_vm2, %v1064_v55  ;;  %v1054_v18 = vmul.f32 %v1812_v43, %v2604_v3  ;;  %v1814_v60 = vpop.eup %1813 }
 0x501   : > { %1823 = vrcp.f32 %v1028_v17  ;;  %v1055_v54 = vmul.f32 %v1814_v60, %v2606_v59 }
 0x502   : > { %v1065_v0 = vpack.c.bf16 %v1054_v18, %v1053_v51 }
 0x503   : > { %v1816_v1 = vpop.eup %1815 }
 0x504   : > { %1598 = vmatprep.mubr.msk.bf16.mxu1 %vm884_vm2, %v1065_v0  ;;  %v1056_v63 = vmul.f32 %v1816_v1, %v2612_v6  ;;  %v1818_v2 = vpop.eup %1817 }
 0x505   : > { %v1057_v19 = vmul.f32 %v1818_v2, %v2614_v7 }
 0x506   : > { %v1066_v4 = vpack.c.bf16 %v1056_v63, %v1055_v54 }
 0x507   : > { %v1820_v5 = vpop.eup %1819 }
 0x508   : > { %v1822_v62 = vpop.eup %1821  ;;  %1599 = vmatmul.mubr.msk.bf16.gmra.mrb[24].mxu1 %vm884_vm2, %v1066_v4  ;;  %v1058_v3 = vmul.f32 %v1820_v5, %v2620_v10 }
 0x509   : > { %v1059_v59 = vmul.f32 %v1822_v62, %v2622_v11 }
 0x50a   : > { %v1067_v9 = vpack.c.bf16 %v1058_v3, %v1057_v19 }
 0x50b   : > { %v1824_v8 = vpop.eup %1823 }
 0x50c   : > { %v1060_v6 = vmul.f32 %v1824_v8, %v2628_v14  ;;  %1602 = vmatprep.mubr.msk.bf16.mxu1 %vm884_vm2, %v1067_v9 }
 0x50e   : > { %v1068_v12 = vpack.c.bf16 %v1060_v6, %v1059_v59 }
 0x510   : > { %1603 = vmatmul.mubr.msk.bf16.gmra.mrb[28].mxu1 %vm884_vm2, %v1068_v12 }
 0x5cb   : > { %v1592_v13 = vpop.f32.mrb[16].mxu1 }
 0x5cc   : > { %1224 = vst [vmem:[%s2409_s4 + $0x10] sm:$0xff] %v1592_v13  ;;  %v1159_v7 = vpop.f32.mrb[17].mxu1 }
 0x5cd   : > { %1222 = vst [vmem:[%s2409_s4] sm:$0xff] %v1159_v7  ;;  %v1593_v10 = vpop.f32.mrb[18].mxu1 }
 0x5ce   : > { %1225 = vst [vmem:[%s2409_s4 + $0x18] sm:$0xff] %v1593_v10  ;;  %v1162_v11 = vpop.f32.mrb[19].mxu1 }
 0x5cf   : > { %1223 = vst [vmem:[%s2409_s4 + $0x8] sm:$0xff] %v1162_v11 }
 0x5d3   : > { %v1596_v14 = vpop.f32.mrb[20].mxu1 }
 0x5d4   : > { %1228 = vst [vmem:[%s2409_s4 + $0x30] sm:$0xff] %v1596_v14  ;;  %v1175_v21 = vpop.f32.mrb[21].mxu1 }
 0x5d5   : > { %1226 = vst [vmem:[%s2409_s4 + $0x20] sm:$0xff] %v1175_v21  ;;  %v1597_v22 = vpop.f32.mrb[22].mxu1 }
 0x5d6   : > { %1229 = vst [vmem:[%s2409_s4 + $0x38] sm:$0xff] %v1597_v22  ;;  %v1178_v23 = vpop.f32.mrb[23].mxu1 }
 0x5d7   : > { %1227 = vst [vmem:[%s2409_s4 + $0x28] sm:$0xff] %v1178_v23 }
 0x5db   : > { %v1600_v24 = vpop.f32.mrb[24].mxu1 }
 0x5dc   : > { %1232 = vst [vmem:[%s2409_s4 + $0x50] sm:$0xff] %v1600_v24  ;;  %v1191_v25 = vpop.f32.mrb[25].mxu1 }
 0x5dd   : > { %1230 = vst [vmem:[%s2409_s4 + $0x40] sm:$0xff] %v1191_v25  ;;  %v1601_v26 = vpop.f32.mrb[26].mxu1 }
 0x5de   : > { %1233 = vst [vmem:[%s2409_s4 + $0x58] sm:$0xff] %v1601_v26  ;;  %v1194_v20 = vpop.f32.mrb[27].mxu1 }
 0x5df   : > { %1231 = vst [vmem:[%s2409_s4 + $0x48] sm:$0xff] %v1194_v20 }
 0x5e3   : > { %v1604_v27 = vpop.f32.mrb[28].mxu1 }
 0x5e4   : > { %1236 = vst [vmem:[%s2409_s4 + $0x70] sm:$0xff] %v1604_v27  ;;  %v1207_v28 = vpop.f32.mrb[29].mxu1 }
 0x5e5   : > { %1234 = vst [vmem:[%s2409_s4 + $0x60] sm:$0xff] %v1207_v28  ;;  %v1605_v29 = vpop.f32.mrb[30].mxu1 }
 0x5e6   : > { %1237 = vst [vmem:[%s2409_s4 + $0x78] sm:$0xff] %v1605_v29  ;;  %v1210_v31 = vpop.f32.mrb[31].mxu1 }
 0x5e7   : > { %1235 = vst [vmem:[%s2409_s4 + $0x68] sm:$0xff] %v1210_v31 }
 0x5e8   : > { %1926 = shalt.err (!%p1923_p2)
}
 0x5e9   : > { %s1927_s4 = scalar_lea.hbm %s2677_s11, 2048  ;;  %s1931_s21 = scalar_lea.hbm %s2805_s3, 8192 }
 0x5ea   : > { %p1928_p11 = scmp.ne.s32.totalorder %s2677_s11, %s1927_s4  ;;  %p1932_p13 = scmp.lt.u32.totalorder %s2677_s11, %s2805_s3 }
 0x5eb   : > { %p1933_p0 = scmp.lt.u32.totalorder %s1931_s21, %s1927_s4  ;;  %p1935_p1 = scmp.lt.u32.totalorder %s1927_s4, %s2677_s11 }
 0x5ec   : > { %p1929_p5 = pnand %p1928_p11, %p2208_p10 }
 0x5ed   : > { %p1934_p9 = por %p1933_p0, %p1932_p13 }
 0x5ee   : > { %p1930_p4 = pneg %p1929_p5 }
 0x5ef   : > { %p1936_p12 = por %p1935_p1, %p1934_p9 }
 0x5f1   : > { %p1937_p7 = pnand %p1936_p12, %p1930_p4 }
 0x5f3   : > { %1940 = shalt.err (!%p1937_p7)
}
 0x5f4   : > { %s2052_s18 = smov 128   ;;  %s2053_s10 = smov 8  }
 0x5f5   : > { %1630 = dma.vmem_to_hbm [thread:$0]  (%p2208_p10), %s2679_s5, 2048, %s2677_s11, %s1239_s29, %s2052_s18, %s2052_s18, %s2053_s10  }
 0x5f6 PF: > { %s2806_s30 = sld [smem:[#allocation14_spill]]  ;;  %s2807_s25 = sld [smem:[#allocation16_spill]] }
 0x5f7   : > { %p1650_p3 = scmp.ge.s32.totalorder %s2043_s28, 2 }
 0x5fc   : > { %s1269_s7 = sand.u32 1, %s2806_s30   ;;  %p2808_p6 = scmp.ne.s32.totalorder %s2807_s25, 0 }
 0x5fd   : > { %s1270_s13 = scalar_lea.sflag [#allocation5], %s1269_s7 }
 0x5fe   : > { %p1644_p8 = pnand %p1650_p3, %p2808_p6 }
 0x600   : > { %1998 = dma.done.wait (!%p1644_p8), %s1270_s13, 2048  }
 0x601   : > { %2000 = vsyncadd (!%p1644_p8), %s1270_s13, 4294965248  ;;  %s24_s28 = sadd.s32 1, %s2043_s28   ;;  %s2809_s16 = sld [smem:[#allocation17_spill]] }
 0x602   : > { %p21_p2 = scmp.ge.s32.totalorder %s24_s28, 6   ;;  %s2810_s6 = sld [smem:[#allocation19_spill]] }
 0x603   : > { %s2811_s18 = smov %s2007_s19  ;;  %s2812_s19 = smov %s2011_s20 }
 0x604   : > { %s2813_s20 = smov %s2286_s14  ;;  %s2814_s21 = smov %s2019_s22 }
 0x605   : > { %s2815_s22 = smov %s2023_s23  ;;  %s2816_s23 = smov %s2231_s8 }
 0x606   : > { %s2817_s24 = smov %s2035_s26  ;;  %s2818_s25 = smov %s2039_s27 }
 0x607   : > { %s2819_s26 = smov %s2809_s16  ;;  %23 = sbr.rel (!%p21_p2) target bundleno = 16 (0x10), region = 109 }
 0x608   : > { %s2820_s27 = smov %s2810_s6 }
 0x60e   :  { %1275 = vsyncpa [#allocation4], 1 }
 0x60f   :  { %1277 = vsyncpa [#allocation4 + $0x1], 1 }
 0x610   :  { %1278 = vsyncpa [#allocation7], 1 }
 0x611   :  { %1280 = vsyncpa [#allocation7 + $0x1], 1 }
 0x612   :  { %1281 = vsyncpa [#allocation5], 1 }
 0x613   :  { %1283 = vsyncpa [#allocation5 + $0x1], 1 }

</bundles_post_ra>
